<compile_context>
chip_gen: v5e
topology: v5e:2x2
jax: 0.10.0
libtpu: 0.0.40
codegen_flags: <defaults>
</compile_context>

<pallas_src>
import functools

import jax
import jax.numpy as jnp
from jax.experimental import pallas as pl
from jax.experimental.pallas import tpu as pltpu

_LANE = 128


def _round_up(n, m):
    return ((n + m - 1) // m) * m


def _vmem_capacity_bytes():
    # Trace-time hardware query; conservative 64 MiB (v7x) fallback.
    try:
        return int(pltpu.get_tpu_info().vmem_capacity_bytes)
    except Exception:
        return 64 * 2**20


def _plan_h_tile(tb, Dp, Hp, w_item, x_item, out_item, vmem_budget):
    """Largest hidden tile (multiple of 128, dividing Hp) that fits the budget."""
    n_lane = Hp // _LANE
    fixed = (2 * tb * Dp * x_item          # X tile, double-buffered
             + 2 * tb * Dp * out_item      # out tile, double-buffered
             + tb * Dp * 4                 # f32 accumulator scratch
             + Dp * 4)                     # b2 (f32)

    def footprint(th, nh):
        wbuf = 1 if nh == 1 else 2         # single-buffer weights only if resident
        return (fixed
                + wbuf * 2 * Dp * th * w_item   # W1 + W2 tiles
                + wbuf * th * 4                 # b1 tile (f32)
                + tb * th * 4)                  # f32 hidden intermediate

    th, nh = _LANE, n_lane
    for cand_nh in range(1, n_lane + 1):
        if n_lane % cand_nh:
            continue
        cand_th = Hp // cand_nh
        if footprint(cand_th, cand_nh) <= vmem_budget:
            th, nh = cand_th, cand_nh
            break
    return th, nh, footprint(th, nh)


def _residual_block_kernel(x_ref, w1_ref, b1_ref, w2_ref, b2_ref, o_ref, acc_ref):
    kh = pl.program_id(1)

    @pl.when(kh == 0)
    def _init():
        acc_ref[...] = jnp.zeros_like(acc_ref)

    x = x_ref[...]                                               # (TB, Dp)
    # Linear 1 + ReLU (hidden activation) for this hidden tile, f32 accumulation.
    h = jnp.dot(x, w1_ref[...], preferred_element_type=jnp.float32)
    h = jnp.maximum(h + b1_ref[...], 0.0)                        # (TB, TH) f32
    # Partial Linear 2 into the f32 accumulator.
    acc_ref[...] += jnp.dot(h.astype(w2_ref.dtype), w2_ref[...],
                            preferred_element_type=jnp.float32)  # (TB, Dp) f32

    @pl.when(kh == pl.num_programs(1) - 1)
    def _finalize():
        # Bias + residual add + output activation (ReLU).
        y = acc_ref[...] + b2_ref[...] + x.astype(jnp.float32)
        o_ref[...] = jnp.maximum(y, 0.0).astype(o_ref.dtype)


def prepare_residual_block_params(w1, b1, w2, b2, *, compute_dtype=jnp.bfloat16):
    """Cast + zero-pad block weights ONCE (call at model-load time).

    w1: (D, H), w2: (H, D) stored as (in_features, out_features); biases f32.
    Zero padding keeps padded lanes exactly zero through matmul + bias +
    residual + ReLU, so padded activations chain across blocks unchanged.
    """
    D, H = w1.shape
    assert w2.shape == (H, D)
    Dp, Hp = _round_up(D, _LANE), _round_up(H, _LANE)
    w1p = jnp.pad(w1.astype(compute_dtype), ((0, Dp - D), (0, Hp - H)))
    w2p = jnp.pad(w2.astype(compute_dtype), ((0, Hp - H), (0, Dp - D)))
    b1p = jnp.pad(jnp.reshape(b1, (1, H)).astype(jnp.float32), ((0, 0), (0, Hp - H)))
    b2p = jnp.pad(jnp.reshape(b2, (1, D)).astype(jnp.float32), ((0, 0), (0, Dp - D)))
    return w1p, b1p, w2p, b2p


def pad_activations(x, *, compute_dtype=jnp.bfloat16):
    """Cast + lane-pad activations once at the model boundary."""
    B, D = x.shape
    Dp = _round_up(D, _LANE)
    x = x.astype(compute_dtype)
    if Dp != D:
        x = jnp.pad(x, ((0, 0), (0, Dp - D)))
    return x


@functools.partial(jax.jit, static_argnames=("block_b",))
def residual_block_padded(x, w1, b1, w2, b2, *, block_b=256):
    """Fused ResidualBlock on lane-padded operands.

    x: (B, Dp) compute-dtype, Dp % 128 == 0, padded lanes zero.
    w1/b1/w2/b2: output of prepare_residual_block_params.
    Returns (B, Dp) in x.dtype with padded lanes still zero (chainable).
    """
    B, Dp = x.shape
    Hp = w1.shape[1]
    assert Dp % _LANE == 0 and Hp % _LANE == 0
    assert w1.shape == (Dp, Hp) and w2.shape == (Hp, Dp)
    assert b1.shape == (1, Hp) and b2.shape == (1, Dp)

    out_dtype = x.dtype
    x_item = jnp.dtype(x.dtype).itemsize
    w_item = jnp.dtype(w1.dtype).itemsize
    out_item = jnp.dtype(out_dtype).itemsize

    # ---- Batch tile: packed-sublane aligned, >= 2 grid steps when B allows
    # (keeps both v7x TensorCores busy; harmless on 1-TC v5e/v6e).
    sub = {1: 32, 2: 16, 4: 8}.get(x_item, 8)
    tb = min(block_b, _round_up(pl.cdiv(B, 2), sub))
    tb = max(sub, min(tb, _round_up(B, sub)))
    grid_b = pl.cdiv(B, tb)

    # ---- Generation-aware VMEM budget (leave ~20% headroom for Mosaic scratch).
    vmem_budget = int(0.80 * _vmem_capacity_bytes())

    # ---- Hidden-dim tiling plan: resident weights if they fit, else stream.
    th, nh, footprint = _plan_h_tile(tb, Dp, Hp, w_item, x_item, out_item, vmem_budget)
    resident = nh == 1
    vmem_limit = int(min(vmem_budget, max(32 * 2**20, 2 * footprint)))

    def _wspec(shape, imap):
        if resident:
            # Grid-invariant: single-buffer to halve the resident weight footprint.
            return pl.BlockSpec(shape, imap, pipeline_mode=pl.Buffered(1))
        return pl.BlockSpec(shape, imap)

    w_passes = 1 if resident else grid_b
    cost = pl.CostEstimate(
        flops=4 * B * Dp * Hp,             # two matmuls: 2*B*Dp*Hp each (padded dims)
        transcendentals=0,
        bytes_accessed=(B * Dp * x_item + B * Dp * out_item
                        + w_passes * (2 * Dp * Hp * w_item + Hp * 4) + Dp * 4),
    )

    return pl.pallas_call(
        _residual_block_kernel,
        out_shape=jax.ShapeDtypeStruct((B, Dp), out_dtype),
        grid_spec=pltpu.PrefetchScalarGridSpec(
            num_scalar_prefetch=0,
            grid=(grid_b, nh),
            in_specs=[
                # X tile: streamed over the batch axis (double-buffered).
                pl.BlockSpec((tb, Dp), lambda i, kh: (i, 0)),
                # Weights / b1: resident (single-buffered) or streamed over H.
                _wspec((Dp, th), lambda i, kh: (0, kh)),
                _wspec((1, th), lambda i, kh: (0, kh)),
                _wspec((th, Dp), lambda i, kh: (kh, 0)),
                # b2 is grid-invariant either way.
                pl.BlockSpec((1, Dp), lambda i, kh: (0, 0),
                             pipeline_mode=pl.Buffered(1)),
            ],
            out_specs=pl.BlockSpec((tb, Dp), lambda i, kh: (i, 0)),
            scratch_shapes=[pltpu.VMEM((tb, Dp), jnp.float32)],
        ),
        compiler_params=pltpu.CompilerParams(
            dimension_semantics=("parallel", "arbitrary"),
            vmem_limit_bytes=vmem_limit,
        ),
        cost_estimate=cost,
    )(x, w1, b1, w2, b2)


@functools.partial(jax.jit, static_argnames=("block_b", "compute_dtype"))
def residual_block(x, w1, b1, w2, b2, *, block_b=256, compute_dtype=jnp.bfloat16):
    """One-shot convenience wrapper: pads once, runs the kernel, un-pads once.

    For multi-block models, call prepare_residual_block_params / pad_activations
    once and chain residual_block_padded to avoid per-block pad/slice HBM passes.
    """
    B, D = x.shape
    out_dtype = x.dtype
    params = prepare_residual_block_params(w1, b1, w2, b2, compute_dtype=compute_dtype)
    xp = pad_activations(x, compute_dtype=compute_dtype)
    yp = residual_block_padded(xp, *params, block_b=block_b)
    return yp[:, :D].astype(out_dtype)


def _ref_forward(x, w1, b1, w2, b2):
    h = jnp.maximum(x @ w1 + b1, 0.0)
    y = h @ w2 + b2 + x
    return jnp.maximum(y, 0.0)


if __name__ == "__main__":
    # Small shapes implied by the module: batch=16, input_dim=32, hidden_dim=64.
    B, D, H = 16, 32, 64
    key = jax.random.PRNGKey(0)
    kx, k1, kb1, k2, kb2 = jax.random.split(key, 5)

    x = jax.random.normal(kx, (B, D), dtype=jnp.float32)

    # Deterministic PyTorch-style Linear init: U(-1/sqrt(fan_in), 1/sqrt(fan_in)).
    lim1 = 1.0 / (D ** 0.5)
    lim2 = 1.0 / (H ** 0.5)
    w1 = jax.random.uniform(k1, (D, H), jnp.float32, -lim1, lim1)
    b1 = jax.random.uniform(kb1, (H,), jnp.float32, -lim1, lim1)
    w2 = jax.random.uniform(k2, (H, D), jnp.float32, -lim2, lim2)
    b2 = jax.random.uniform(kb2, (D,), jnp.float32, -lim2, lim2)

    ref = _ref_forward(x, w1, b1, w2, b2)

    # f32 compute path — tight tolerance vs reference.
    out_f32 = jax.block_until_ready(
        residual_block(x, w1, b1, w2, b2, compute_dtype=jnp.float32))
    assert out_f32.shape == (B, D)
    assert jnp.allclose(out_f32, ref, atol=1e-5, rtol=1e-5), "f32 mismatch vs reference"

    # Default bf16 compute path (bf16 X/W, f32 accumulation) — looser tolerance.
    out_bf16 = jax.block_until_ready(residual_block(x, w1, b1, w2, b2))
    assert out_bf16.shape == (B, D)
    assert jnp.allclose(out_bf16, ref, atol=1e-1, rtol=1e-1), "bf16 mismatch vs reference"

    # Padded / chained path: pad once at the model boundary, run two blocks
    # back-to-back with no per-block pad or slice, un-pad once at the end.
    params = prepare_residual_block_params(w1, b1, w2, b2, compute_dtype=jnp.float32)
    xp = pad_activations(x, compute_dtype=jnp.float32)
    y1 = residual_block_padded(xp, *params)
    y2 = jax.block_until_ready(residual_block_padded(y1, *params))
    ref2 = _ref_forward(ref, w1, b1, w2, b2)
    assert y2.shape[0] == B
    assert jnp.allclose(y2[:, :D], ref2, atol=1e-3, rtol=1e-3), "chained padded mismatch"

    print("KERNEL_OK")
</pallas_src>

<mosaic_0001>
module attributes {stable_mosaic.version = 11 : i64} {
  func.func @_residual_block_kernel(%arg0: i32, %arg1: i32, %arg2: memref<8x128xf32, #tpu.memory_space<vmem>>, %arg3: memref<128x128xf32, #tpu.memory_space<vmem>>, %arg4: memref<1x128xf32, #tpu.memory_space<vmem>>, %arg5: memref<128x128xf32, #tpu.memory_space<vmem>>, %arg6: memref<1x128xf32, #tpu.memory_space<vmem>>, %arg7: memref<8x128xf32, #tpu.memory_space<vmem>>, %arg8: memref<8x128xf32, #tpu.memory_space<vmem>>) attributes {dimension_semantics = [#tpu.dimension_semantics<parallel>, #tpu.dimension_semantics<arbitrary>], iteration_bounds = array<i64: 2, 1>, scalar_prefetch = 0 : i64, scratch_operands = 1 : i64, tpu.core_type = #tpu.core_type<tc>, window_params = [{transform_indices = @transform_0, window_bounds = array<i64: 8, 128>}, {pipeline_mode = #tpu.pipeline_mode<synchronous>, transform_indices = @transform_1, window_bounds = array<i64: 128, 128>}, {pipeline_mode = #tpu.pipeline_mode<synchronous>, transform_indices = @transform_2, window_bounds = array<i64: 1, 128>}, {pipeline_mode = #tpu.pipeline_mode<synchronous>, transform_indices = @transform_3, window_bounds = array<i64: 128, 128>}, {pipeline_mode = #tpu.pipeline_mode<synchronous>, transform_indices = @transform_4, window_bounds = array<i64: 1, 128>}, {transform_indices = @transform_5, window_bounds = array<i64: 8, 128>}]} {
    %c0_i32 = arith.constant 0 : i32
    %0 = arith.cmpi eq, %arg1, %c0_i32 : i32
    %1 = arith.extui %0 : i1 to i32
    %c0_i32_0 = arith.constant 0 : i32
    %2 = arith.cmpi ne, %1, %c0_i32_0 : i32
    scf.if %2 {
      %cst_16 = arith.constant 0.000000e+00 : f32
      %19 = vector.broadcast %cst_16 : f32 to vector<8x128xf32>
      %c0_17 = arith.constant 0 : index
      %c0_18 = arith.constant 0 : index
      %20 = vector.load %arg8[%c0_17, %c0_18] : memref<8x128xf32, #tpu.memory_space<vmem>>, vector<8x128xf32>
      tpu.vector_store %arg8[%c0_17, %c0_18], %19 {strides = array<i32>} : memref<8x128xf32, #tpu.memory_space<vmem>>, vector<8x128xf32>,
    } else {
    }
    %c0 = arith.constant 0 : index
    %c0_1 = arith.constant 0 : index
    %3 = vector.load %arg2[%c0, %c0_1] : memref<8x128xf32, #tpu.memory_space<vmem>>, vector<8x128xf32>
    %c0_2 = arith.constant 0 : index
    %c0_3 = arith.constant 0 : index
    %4 = vector.load %arg3[%c0_2, %c0_3] : memref<128x128xf32, #tpu.memory_space<vmem>>, vector<128x128xf32>
    %cst = arith.constant dense<0.000000e+00> : vector<8x128xf32>
    %5 = tpu.matmul %3, %4, %cst {dimension_numbers = #tpu.dot_dimension_numbers<[1], [0], [0], [1], [0, 0, 1, 1], [], []>} : vector<8x128xf32>, vector<128x128xf32>, vector<8x128xf32> -> vector<8x128xf32>
    %c0_4 = arith.constant 0 : index
    %c0_5 = arith.constant 0 : index
    %6 = vector.load %arg4[%c0_4, %c0_5] : memref<1x128xf32, #tpu.memory_space<vmem>>, vector<1x128xf32>
    %7 = vector.broadcast %6 : vector<1x128xf32> to vector<8x128xf32>
    %8 = arith.addf %5, %7 : vector<8x128xf32>
    %cst_6 = arith.constant 0.000000e+00 : f32
    %9 = vector.broadcast %cst_6 : f32 to vector<8x128xf32>
    %10 = arith.maximumf %8, %9 : vector<8x128xf32>
    %c0_7 = arith.constant 0 : index
    %c0_8 = arith.constant 0 : index
    %11 = vector.load %arg8[%c0_7, %c0_8] : memref<8x128xf32, #tpu.memory_space<vmem>>, vector<8x128xf32>
    %c0_9 = arith.constant 0 : index
    %c0_10 = arith.constant 0 : index
    %12 = vector.load %arg5[%c0_9, %c0_10] : memref<128x128xf32, #tpu.memory_space<vmem>>, vector<128x128xf32>
    %cst_11 = arith.constant dense<0.000000e+00> : vector<8x128xf32>
    %13 = tpu.matmul %10, %12, %cst_11 {dimension_numbers = #tpu.dot_dimension_numbers<[1], [0], [0], [1], [0, 0, 1, 1], [], []>} : vector<8x128xf32>, vector<128x128xf32>, vector<8x128xf32> -> vector<8x128xf32>
    %14 = arith.addf %11, %13 : vector<8x128xf32>
    %c0_12 = arith.constant 0 : index
    %c0_13 = arith.constant 0 : index
    %15 = vector.load %arg8[%c0_12, %c0_13] : memref<8x128xf32, #tpu.memory_space<vmem>>, vector<8x128xf32>
    tpu.vector_store %arg8[%c0_12, %c0_13], %14 {strides = array<i32>} : memref<8x128xf32, #tpu.memory_space<vmem>>, vector<8x128xf32>,
    %c0_i32_14 = arith.constant 0 : i32
    %16 = arith.cmpi eq, %arg1, %c0_i32_14 : i32
    %17 = arith.extui %16 : i1 to i32
    %c0_i32_15 = arith.constant 0 : i32
    %18 = arith.cmpi ne, %17, %c0_i32_15 : i32
    scf.if %18 {
      %c0_16 = arith.constant 0 : index
      %c0_17 = arith.constant 0 : index
      %19 = vector.load %arg8[%c0_16, %c0_17] : memref<8x128xf32, #tpu.memory_space<vmem>>, vector<8x128xf32>
      %c0_18 = arith.constant 0 : index
      %c0_19 = arith.constant 0 : index
      %20 = vector.load %arg6[%c0_18, %c0_19] : memref<1x128xf32, #tpu.memory_space<vmem>>, vector<1x128xf32>
      %21 = vector.broadcast %20 : vector<1x128xf32> to vector<8x128xf32>
      %22 = arith.addf %19, %21 : vector<8x128xf32>
      %23 = arith.addf %22, %3 : vector<8x128xf32>
      %cst_20 = arith.constant 0.000000e+00 : f32
      %24 = vector.broadcast %cst_20 : f32 to vector<8x128xf32>
      %25 = arith.maximumf %23, %24 : vector<8x128xf32>
      %c0_21 = arith.constant 0 : index
      %c0_22 = arith.constant 0 : index
      %26 = vector.load %arg7[%c0_21, %c0_22] : memref<8x128xf32, #tpu.memory_space<vmem>>, vector<8x128xf32>
      tpu.vector_store %arg7[%c0_21, %c0_22], %25 {strides = array<i32>} : memref<8x128xf32, #tpu.memory_space<vmem>>, vector<8x128xf32>,
    } else {
    }
    return
  }
  func.func @transform_0(%arg0: i32, %arg1: i32) -> (i32, i32) {
    %c0_i32 = arith.constant 0 : i32
    %c0_i32_0 = arith.constant 0 : i32
    return %arg0, %c0_i32 : i32, i32
  }
  func.func @transform_1(%arg0: i32, %arg1: i32) -> (i32, i32) {
    %c0_i32 = arith.constant 0 : i32
    %c0_i32_0 = arith.constant 0 : i32
    return %c0_i32, %arg1 : i32, i32
  }
  func.func @transform_2(%arg0: i32, %arg1: i32) -> (i32, i32) {
    %c0_i32 = arith.constant 0 : i32
    %c0_i32_0 = arith.constant 0 : i32
    return %c0_i32, %arg1 : i32, i32
  }
  func.func @transform_3(%arg0: i32, %arg1: i32) -> (i32, i32) {
    %c0_i32 = arith.constant 0 : i32
    %c0_i32_0 = arith.constant 0 : i32
    return %arg1, %c0_i32 : i32, i32
  }
  func.func @transform_4(%arg0: i32, %arg1: i32) -> (i32, i32) {
    %c0_i32 = arith.constant 0 : i32
    %c0_i32_0 = arith.constant 0 : i32
    %c0_i32_1 = arith.constant 0 : i32
    return %c0_i32, %c0_i32_0 : i32, i32
  }
  func.func @transform_5(%arg0: i32, %arg1: i32) -> (i32, i32) {
    %c0_i32 = arith.constant 0 : i32
    %c0_i32_0 = arith.constant 0 : i32
    return %arg0, %c0_i32 : i32, i32
  }
}

</mosaic_0001>

<bundles_post_ra>
// kernel: residual_block_padded.1
= control target key start
LH: loop header
LB: loop body
LE: loop exit
PB: predicated region body
PF: predicated region fallthrough
CT: control target
= control target key end

     0   :  { %10 = vsyncpa [#allocation4], 0  ;;  %s1018_s0 = inlined_call_operand.hbm [shape: f32[16,128], index: 0, kind: input, shape index: {}]   ;;  %s1019_s1 = inlined_call_operand.hbm [shape: f32[128,128], index: 1, kind: input, shape index: {}]   ;;  %s1020_s2 = inlined_call_operand.vmem [shape: f32[1,128], index: 2, kind: input, shape index: {}]   ;;  %s1021_s3 = inlined_call_operand.hbm [shape: f32[128,128], index: 3, kind: input, shape index: {}]   ;;  %s1022_s4 = inlined_call_operand.vmem [shape: f32[1,128], index: 4, kind: input, shape index: {}]   ;;  %s1023_s5 = inlined_call_operand.hbm [shape: f32[16,128], index: 5, kind: output, shape index: {}]  }
   0x1   :  { %12 = vsyncpa [#allocation4 + $0x1], 0 }
   0x2   :  { %13 = vsyncpa [#allocation7], 0 }
   0x3   :  { %14 = vsyncpa [#allocation5], 0 }
   0x4   :  { %16 = vsyncpa [#allocation5 + $0x1], 0  ;;  %s861_s18 = smov 0   ;;  %s863_s19 = smov 0  }
   0x5   :  { %s865_s20 = smov 0   ;;  %s867_s21 = smov 0  }
   0x6   :  { %s869_s22 = smov 0   ;;  %s871_s23 = smov 0  }
   0x7 LB: > { %s544_s24 = sadd.s32 4294967295, %s825_s23   ;;  %p546_p0 = scmp.ge.s32.totalorder %s825_s23, 1  ;;  %s825_s23 = sphi %s871_s23, %s22_s23   ;;  %s821_s22 = sphi %s869_s22, %s1033_s22   ;;  %s817_s21 = sphi %s867_s21, %s1032_s21   ;;  %s813_s20 = sphi %s865_s20, %s1031_s20   ;;  %s809_s19 = sphi %s863_s19, %s1030_s19   ;;  %s805_s18 = sphi %s861_s18, %s1029_s18  }
   0x8   : > { %p895_p1 = scmp.eq.s32.totalorder %s544_s24, 0  ;;  %p190_p2 = scmp.lt.s32.totalorder %s825_s23, 3 }
   0x9   : > { %s203_s28 = sshll.u32 %s1019_s1, 4  ;;  %s827_s30 = smov [#allocation6]   ;;  %s204_s28 = int_to_ptr.hbm [resolvable:$true] %s203_s28 }
   0xa   : > { %p903_p3 = pnand %p546_p0, %p190_p2  ;;  %s205_s6 = sshll.u32 %s827_s30, 4  ;;  %s206_s6 = int_to_ptr.vmem [resolvable:$true] %s205_s6 }
   0xb   : > { %p550_p6 = scmp.ge.s32.totalorder %s825_s23, 2  ;;  %s226_s9 = sshll.u32 %s1021_s3, 4  ;;  %s227_s9 = int_to_ptr.hbm [resolvable:$true] %s226_s9 }
   0xc   : > { %p574_p4 = pneg %p903_p3  ;;  %s828_s10 = smov 128  }
   0xd   : > { %s829_s11 = smov 8   ;;  %s830_s12 = smov [#allocation8]  }
   0xe   : > { %p575_p5 = pnand %p574_p4, %p895_p1  ;;  %s228_s13 = sshll.u32 %s830_s12, 4  ;;  %s229_s13 = int_to_ptr.vmem [resolvable:$true] %s228_s13 }
   0xf   : > { %s34_s14 = sadd.s32 1, %s821_s22  ;;  %s545_s15 = sadd.s32 4294967294, %s825_s23  }
  0x10   : > { %577 = dma.hbm_to_vmem [thread:$0]  (!%p575_p5), %s204_s28, 2048, %s206_s6, [#allocation7], %s828_s10, %s828_s10, %s829_s11  }
  0x11   : > { %580 = dma.hbm_to_vmem [thread:$0]  (!%p575_p5), %s227_s9, 2048, %s229_s13, [#allocation7], %s828_s10, %s828_s10, %s829_s11  }
  0x12   : > { %p36_p7 = scmp.ge.s32.totalorder %s34_s14, 2  ;;  %s41_s16 = sadd.s32 1, %s813_s20 }
  0x13   : > { %p48_p8 = scmp.ne.s32.totalorder %s813_s20, %s809_s19  ;;  %p49_p9 = scmp.eq.s32.totalorder %s825_s23, 0 }
  0x14   : > { %s1035_s14 = smov (%p36_p7, %s34_s14), 0  ;;  %p54_p10 = scmp.ne.s32.totalorder %s809_s19, %s805_s18 }
  0x15   : > { %s38_s17 = ssub.s32 %s821_s22, %s1035_s14  ;;  %p177_p11 = scmp.eq.s32.totalorder %s544_s24, 1 }
  0x16   : > { %p39_p12 = scmp.eq.s32.totalorder %s38_s17, 0  ;;  %p931_p13 = por %p895_p1, %p54_p10 }
  0x17   : > { %p935_p0 = por %p177_p11, %p48_p8  ;;  %p183_p2 = scmp.eq.s32.totalorder %s545_s15, 1 }
  0x18   : > { %s940_s28 = scalar_select %p39_p12, %s813_s20, %s41_s16  }
  0x19   : > { %p50_p4 = por %p49_p9, %p48_p8  ;;  %p942_p5 = por %p183_p2, %p54_p10 }
  0x1a   : > { %s245_s6 = sand.u32 1, %s813_s20   ;;  %s552_s24 = sshll.u32 %s821_s22, 3 }
  0x1b   : > { %p591_p7 = scmp.lt.s32.totalorder %s825_s23, 2  ;;  %s551_s7 = sshll.u32 %s245_s6, 3 }
  0x1c   : > { %s253_s10 = scalar_lea.hbm %s1018_s0, %s552_s24  ;;  %s249_s12 = scalar_lea.vmem [#allocation3], %s551_s7 }
  0x1d   : > { %s255_s11 = sshll.u32 %s253_s10, 4  ;;  %s257_s13 = sshll.u32 %s249_s12, 4  ;;  %s256_s11 = int_to_ptr.hbm [resolvable:$true] %s255_s11  ;;  %s258_s13 = int_to_ptr.vmem [resolvable:$true] %s257_s13 }
  0x1e   : > { %p582_p11 = pnand %p591_p7, %p50_p4  ;;  %s246_s15 = scalar_lea.sflag [#allocation4], %s245_s6 }
  0x1f   : > { %266 = sbr.rel (%p903_p3) target bundleno = 336 (0x150), region = 40  ;;  %s955_s16 = sand.u32 (!%p903_p3), 1, %s809_s19  }
  0x20   : > { %584 = dma.hbm_to_vmem [thread:$0]  (!%p582_p11), %s256_s11, 128, %s258_s13, %s246_s15  }
  0x21   : > { %s554_s17 = sshll.u32 (!%p903_p3), %s955_s16, 3  ;;  %s269_s24 = scalar_lea.sflag (!%p903_p3), [#allocation4], %s955_s16 }
  0x22   : > { %s961_s7 = scalar_lea.vmem (!%p903_p3), [#allocation3], %s554_s17 }
  0x24   : > { %792 = dma.done.wait (%p931_p13), %s269_s24, 128  }
  0x25   : > { %794 = vsyncadd (%p931_p13), %s269_s24, 4294967168 }
  0x26   : > { %796 = dma.done.wait (%p895_p1), [#allocation7], 4096  }
  0x27   : > { %798 = vsyncadd (%p895_p1), [#allocation7], 4294963200  ;;  %v338_v0 = vld [vmem:[#allocation6 + $0x78] sm:$0xff]  ;;  %v337_v1 = vld [vmem:[#allocation6 + $0x70] sm:$0xff]  ;;  %s559_s26 = sshll.u32 %s817_s21, 3  ;;  %s312_s12 = scalar_lea.vmem [#allocation9], %s554_s17 }
  0x28   : > { %343 = vmatpush.msra.mxu0 %v338_v0  ;;  %v336_v2 = vld [vmem:[#allocation6 + $0x68] sm:$0xff]  ;;  %v335_v3 = vld [vmem:[#allocation6 + $0x60] sm:$0xff]  ;;  %v380_v4 = vld [vmem:[#allocation8 + $0x78] sm:$0xff]  ;;  %s426_s11 = scalar_lea.hbm %s1023_s5, %s559_s26  ;;  %s428_s13 = sshll.u32 %s312_s12, 4  ;;  %s429_s13 = int_to_ptr.vmem [resolvable:$true] %s428_s13 }
  0x29   : > { %v334_v5 = vld [vmem:[#allocation6 + $0x58] sm:$0xff]  ;;  %381 = vmatpush.msra.mxu1 %v380_v4  ;;  %v379_v6 = vld [vmem:[#allocation8 + $0x70] sm:$0xff]  ;;  %v378_v7 = vld [vmem:[#allocation8 + $0x68] sm:$0xff]  ;;  %s430_s15 = sshll.u32 %s426_s11, 4  ;;  %s416_s21 = scalar_lea.sflag [#allocation5], %s955_s16  ;;  %s431_s15 = int_to_ptr.hbm [resolvable:$true] %s430_s15 }
  0x2a   : > { %344 = vmatpush.msra.mxu0 %v337_v1  ;;  %v333_v8 = vld [vmem:[#allocation6 + $0x50] sm:$0xff]  ;;  %v377_v9 = vld [vmem:[#allocation8 + $0x60] sm:$0xff]  ;;  %v332_v10 = vld [vmem:[#allocation6 + $0x48] sm:$0xff]  ;;  %s753_s24 = sshra.s32 %s431_s15, 4  ;;  %s759_s26 = scalar_lea.hbm %s1023_s5, 16  ;;  %s754_s24 = int_to_ptr.hbm [resolvable:$true] %s753_s24 }
  0x2b   : > { %382 = vmatpush.msra.mxu1 %v379_v6  ;;  %v376_v11 = vld [vmem:[#allocation8 + $0x58] sm:$0xff]  ;;  %v331_v12 = vld [vmem:[#allocation6 + $0x40] sm:$0xff]  ;;  %v375_v13 = vld [vmem:[#allocation8 + $0x50] sm:$0xff]  ;;  %p760_p9 = scmp.lt.s32.totalorder %s754_s24, %s1023_s5 }
  0x2c   : > { %345 = vmatpush.msra.mxu0 %v336_v2  ;;  %v330_v14 = vld [vmem:[#allocation6 + $0x38] sm:$0xff]  ;;  %v374_v15 = vld [vmem:[#allocation8 + $0x48] sm:$0xff]  ;;  %v329_v16 = vld [vmem:[#allocation6 + $0x30] sm:$0xff] }
  0x2d   : > { %383 = vmatpush.msra.mxu1 %v378_v7  ;;  %v373_v17 = vld [vmem:[#allocation8 + $0x40] sm:$0xff]  ;;  %v328_v18 = vld [vmem:[#allocation6 + $0x28] sm:$0xff]  ;;  %v372_v19 = vld [vmem:[#allocation8 + $0x38] sm:$0xff] }
  0x2e   : > { %346 = vmatpush.msra.mxu0 %v335_v3  ;;  %v327_v20 = vld [vmem:[#allocation6 + $0x20] sm:$0xff]  ;;  %v371_v21 = vld [vmem:[#allocation8 + $0x30] sm:$0xff]  ;;  %v326_v22 = vld [vmem:[#allocation6 + $0x18] sm:$0xff] }
  0x2f   : > { %384 = vmatpush.msra.mxu1 %v377_v9  ;;  %v370_v23 = vld [vmem:[#allocation8 + $0x28] sm:$0xff]  ;;  %v325_v24 = vld [vmem:[#allocation6 + $0x10] sm:$0xff]  ;;  %v369_v25 = vld [vmem:[#allocation8 + $0x20] sm:$0xff] }
  0x30   : > { %347 = vmatpush.msra.mxu0 %v334_v5  ;;  %v324_v26 = vld [vmem:[#allocation6 + $0x8] sm:$0xff]  ;;  %v368_v27 = vld [vmem:[#allocation8 + $0x18] sm:$0xff]  ;;  %v323_v28 = vld [vmem:[#allocation6] sm:$0xff] }
  0x31   : > { %385 = vmatpush.msra.mxu1 %v376_v11  ;;  %v322_v29 = vld [vmem:[%s961_s7] sm:$0xff]  ;;  %v366_v31 = vld [vmem:[#allocation8 + $0x8] sm:$0xff]  ;;  %v365_v32 = vld [vmem:[#allocation8] sm:$0xff]  ;;  %s755_s7 = scalar_lea.hbm %s754_s24, 8 }
  0x32   : > { %348 = vmatpush.msra.mxu0 %v333_v8  ;;  %v367_v30 = vld [vmem:[#allocation8 + $0x10] sm:$0xff]  ;;  %p756_p1 = scmp.ne.s32.totalorder %s754_s24, %s755_s7  ;;  %p761_p10 = scmp.lt.s32.totalorder %s759_s26, %s755_s7 }
  0x33   : > { %386 = vmatpush.msra.mxu1 %v375_v13  ;;  %v647_v33 = vld [vmem:[%s1020_s2] ss:$0 sm:$0xff] }
  0x34   : > { %349 = vmatpush.msra.mxu0 %v332_v10  ;;  %v648_v37 = vld [vmem:[%s1022_s4] ss:$0 sm:$0xff]  ;;  %p757_p3 = pnand %p756_p1, %p935_p0  ;;  %p762_p12 = por %p761_p10, %p760_p9 }
  0x35   : > { %387 = vmatpush.msra.mxu1 %v374_v15 }
  0x36   : > { %350 = vmatpush.msra.mxu0 %v331_v12  ;;  %p758_p8 = pneg %p757_p3 }
  0x37   : > { %388 = vmatpush.msra.mxu1 %v373_v17 }
  0x38   : > { %351 = vmatpush.msra.mxu0 %v330_v14  ;;  %p763_p13 = pnand %p762_p12, %p758_p8 }
  0x39   : > { %389 = vmatpush.msra.mxu1 %v372_v19 }
  0x3a   : > { %352 = vmatpush.msra.mxu0 %v329_v16 }
  0x3b   : > { %390 = vmatpush.msra.mxu1 %v371_v21 }
  0x3c   : > { %353 = vmatpush.msra.mxu0 %v328_v18 }
  0x3d   : > { %391 = vmatpush.msra.mxu1 %v370_v23 }
  0x3e   : > { %354 = vmatpush.msra.mxu0 %v327_v20 }
  0x3f   : > { %392 = vmatpush.msra.mxu1 %v369_v25 }
  0x40   : > { %355 = vmatpush.msra.mxu0 %v326_v22 }
  0x41   : > { %393 = vmatpush.msra.mxu1 %v368_v27 }
  0x42   : > { %356 = vmatpush.msra.mxu0 %v325_v24 }
  0x43   : > { %394 = vmatpush.msra.mxu1 %v367_v30 }
  0x44   : > { %357 = vmatpush.msra.mxu0 %v324_v26 }
  0x45   : > { %395 = vmatpush.msra.mxu1 %v366_v31 }
  0x46   : > { %358 = vmatpush.msra.mxu0 %v323_v28 }
  0x47   : > { %359 = vmatmul.f32.vlgmr.msra.gmra.mxu0 %v322_v29  ;;  %396 = vmatpush.msra.mxu1 %v365_v32 }
  0xc4   : > { %v360_v34 = vpop.f32.mrf.mxu0 }
  0xc5   : > { %v361_v35 = vadd.f32 %v647_v33, %v360_v34 }
  0xc7   : > { %v363_v36 = vmax.f32 %v361_v35, 0.0 }
  0xc9   : > { %397 = vmatmul.f32.vlgmr.msra.gmra.mxu1 %v363_v36 }
 0x146   : > { %v398_v38 = vpop.f32.mrf.mxu1 }
 0x147   : > { %v411_v39 = vadd.f32 %v648_v37, %v398_v38 }
 0x149   : > { %v412_v40 = vadd.f32 %v411_v39, %v322_v29 }
 0x14b   : > { %v413_v41 = vmax.f32 %v412_v40, 0.0 }
 0x14d   : > { %414 = vst [vmem:[%s312_s12] sm:$0xff] %v413_v41 }
 0x14e   : > { %766 = shalt.err (!%p763_p13)
}
 0x14f   : > { %572 = dma.vmem_to_hbm [thread:$0]  (%p935_p0), %s429_s13, 128, %s431_s15, %s416_s21  }
 0x150 PF: > { %s442_s16 = sand.u32 1, %s805_s18   ;;  %p586_p2 = pnand %p550_p6, %p942_p5 }
 0x151   : > { %s443_s8 = scalar_lea.sflag [#allocation5], %s442_s16 }
 0x152   : > { %p587_p4 = pneg %p586_p2 }
 0x154   : > { %800 = dma.done.wait (%p587_p4), %s443_s8, 128  }
 0x155   : > { %802 = vsyncadd (%p587_p4), %s443_s8, 4294967168  ;;  %s22_s23 = sadd.s32 1, %s825_s23   ;;  %s1029_s18 = smov %s809_s19 }
 0x156   : > { %p19_p7 = scmp.ge.s32.totalorder %s22_s23, 4   ;;  %s1030_s19 = smov %s813_s20 }
 0x157   : > { %s1031_s20 = smov %s940_s28  ;;  %s1032_s21 = smov %s821_s22 }
 0x158   : > { %s1033_s22 = smov %s1035_s14  ;;  %21 = sbr.rel (!%p19_p7) target bundleno = 7 (0x7), region = 106 }
 0x15d   :  { %449 = vsyncpa [#allocation4], 1 }
 0x15e   :  { %451 = vsyncpa [#allocation4 + $0x1], 1 }
 0x15f   :  { %452 = vsyncpa [#allocation7], 1 }
 0x160   :  { %453 = vsyncpa [#allocation5], 1 }
 0x161   :  { %455 = vsyncpa [#allocation5 + $0x1], 1 }

</bundles_post_ra>
